<compile_context>
chip_gen: v5e
topology: v5e:2x2
jax: 0.10.0
libtpu: 0.0.40
codegen_flags: <defaults>
</compile_context>

<pallas_src>
from math import sqrt

import jax
import jax.numpy as jnp
from jax.experimental import pallas as pl
from jax.experimental.pallas import tpu as pltpu

_LANE = 128


def _sublane_align(dtype):
    # packed sublane count: 8 for 4-byte, 16 for 2-byte, 32 for 1-byte dtypes
    return max(8, 32 // jnp.dtype(dtype).itemsize)


def _vmem_capacity_bytes():
    try:
        cap = int(pltpu.get_tpu_info().vmem_capacity_bytes)
        if cap > 0:
            return cap
    except Exception:
        pass
    return 64 * 1024 * 1024  # conservative default (v7x per-TensorCore VMEM)


def _pick_tile(dim, align, pref):
    """Largest tile <= pref that is a multiple of `align` and divides `dim` exactly.
    Falls back to the full dim (a full-extent block is always legal)."""
    if dim <= pref:
        return dim
    t = (pref // align) * align
    while t >= align:
        if dim % t == 0:
            return t
        t -= align
    return dim


def _linear_bias_kernel(x_ref, w_ref, b_ref, o_ref):
    """Fused single-K path: out = x @ w + b in one shot (no scratch, no k loop)."""
    acc = jnp.dot(x_ref[...], w_ref[...], preferred_element_type=jnp.float32)
    o_ref[...] = (acc + b_ref[...].astype(jnp.float32)).astype(o_ref.dtype)


def _linear_bias_kernel_ktiled(x_ref, w_ref, b_ref, o_ref, acc_ref):
    """K-tiled path: f32 accumulator in VMEM, bias folded into the k==0 init."""
    k = pl.program_id(2)

    @pl.when(k == 0)
    def _():
        acc_ref[...] = jnp.broadcast_to(
            b_ref[...].astype(jnp.float32), acc_ref.shape)

    acc_ref[...] += jnp.dot(x_ref[...], w_ref[...],
                            preferred_element_type=jnp.float32)

    @pl.when(k == pl.num_programs(2) - 1)
    def _():
        o_ref[...] = acc_ref[...].astype(o_ref.dtype)


def _linear_pallas(x2d, weight, bias):
    """x2d: (M, K); weight: (K, N); bias: (N,) -> (M, N). No padded copies."""
    M, K = x2d.shape
    Kw, N = weight.shape
    assert Kw == K, (Kw, K)
    out_dtype = x2d.dtype
    x_it = jnp.dtype(x2d.dtype).itemsize
    w_it = jnp.dtype(weight.dtype).itemsize
    o_it = jnp.dtype(out_dtype).itemsize

    cap = _vmem_capacity_bytes()
    budget = int(0.40 * cap)                                   # fused working-set budget
    limit = max(32 * 1024 * 1024, min(int(0.75 * cap), 112 * 1024 * 1024))

    # M: full-row block unless M is large and cleanly tileable (sublane-aligned).
    tm = _pick_tile(M, _sublane_align(x2d.dtype), 256)

    # N: if 128 | N and N > 128, split into >=2 lane-aligned tiles (megacore on v7x,
    # weight column-block fetched once each); otherwise one full-width block (legal
    # as the full dim, and avoids inflating the dominant weight read with padding).
    if N % _LANE == 0 and N > _LANE:
        tn = _pick_tile(N, _LANE, min(512, max(_LANE, (N // 2) // _LANE * _LANE)))
    else:
        tn = N

    bias2d = bias.reshape(1, N)

    cost = pl.CostEstimate(
        flops=2 * M * N * K,
        transcendentals=0,
        bytes_accessed=M * K * x_it + K * N * w_it + M * N * o_it + N * w_it,
    )

    # Fused single-K working set: weight/bias/output double-buffered, x counted once
    # (its block index is (i, 0) and is revisited across the N axis).
    fused_bytes = (tm * K * x_it + 2 * K * tn * w_it
                   + 2 * tm * tn * o_it + 2 * tn * w_it)

    pref_k = 2048 if cap >= 96 * 1024 * 1024 else 1024
    tk = _pick_tile(K, _LANE, pref_k)
    # Stay fused if it fits the budget, or if K has no clean lane-aligned split.
    use_fused = (fused_bytes <= budget) or (tk == K)

    common = dict(out_shape=jax.ShapeDtypeStruct((M, N), out_dtype),
                  cost_estimate=cost)

    if use_fused:
        return pl.pallas_call(
            _linear_bias_kernel,
            grid_spec=pltpu.PrefetchScalarGridSpec(
                num_scalar_prefetch=0,
                grid=(N // tn, M // tm),                    # N outer: weight fetched once
                in_specs=[
                    pl.BlockSpec((tm, K), lambda j, i: (i, 0)),
                    pl.BlockSpec((K, tn), lambda j, i: (0, j)),
                    pl.BlockSpec((1, tn), lambda j, i: (0, j)),
                ],
                out_specs=pl.BlockSpec((tm, tn), lambda j, i: (i, j)),
            ),
            compiler_params=pltpu.CompilerParams(
                dimension_semantics=("parallel", "parallel"),
                vmem_limit_bytes=limit,
            ),
            **common,
        )(x2d, weight, bias2d)

    return pl.pallas_call(
        _linear_bias_kernel_ktiled,
        grid_spec=pltpu.PrefetchScalarGridSpec(
            num_scalar_prefetch=0,
            grid=(N // tn, M // tm, K // tk),
            in_specs=[
                pl.BlockSpec((tm, tk), lambda j, i, k: (i, k)),
                pl.BlockSpec((tk, tn), lambda j, i, k: (k, j)),
                pl.BlockSpec((1, tn), lambda j, i, k: (0, j)),
            ],
            out_specs=pl.BlockSpec((tm, tn), lambda j, i, k: (i, j)),
            scratch_shapes=[pltpu.VMEM((tm, tn), jnp.float32)],
        ),
        compiler_params=pltpu.CompilerParams(
            dimension_semantics=("parallel", "parallel", "arbitrary"),
            vmem_limit_bytes=limit,
        ),
        **common,
    )(x2d, weight, bias2d)


@jax.jit
def flatten_head_forward(x, weight, bias):
    """FlattenHead forward.

    x:      (..., D, P)  — last two dims flattened (nn.Flatten(start_dim=-2)).
    weight: (nf, target_window), nf = D * P  (transpose of PyTorch's (out, in)).
    bias:   (target_window,)
    Returns (..., target_window).  Dropout(p=0) is the identity.
    """
    lead = x.shape[:-2]
    nf = x.shape[-2] * x.shape[-1]
    N = weight.shape[1]

    M = 1
    for d in lead:
        M *= d

    x2d = x.reshape(M, nf)                  # row-major == torch.nn.Flatten(-2)
    out2d = _linear_pallas(x2d, weight, bias)
    return out2d.reshape(*lead, N)


def init_flatten_head_params(key, nf, target_window, dtype=jnp.float32,
                             weight_dtype=None):
    """nn.Linear default init: U(-1/sqrt(nf), 1/sqrt(nf)); weight stored (nf, out).

    weight_dtype (e.g. jnp.bfloat16) optionally halves the dominant weight HBM read;
    accumulation stays f32 inside the kernel.  Numerics change, so it is opt-in.
    """
    kw, kb = jax.random.split(key)
    bound = 1.0 / sqrt(nf)
    weight = jax.random.uniform(kw, (nf, target_window), dtype, -bound, bound)
    bias = jax.random.uniform(kb, (target_window,), dtype, -bound, bound)
    if weight_dtype is not None:
        weight = weight.astype(weight_dtype)
    return weight, bias


if __name__ == "__main__":
    key = jax.random.PRNGKey(0)
    k_x, k_p, k_x2, k_p2 = jax.random.split(key, 4)

    # FlattenHead-like shapes: x is (batch, n_vars, d_model, patch_num);
    # nf = d_model * patch_num; target_window deliberately NOT a multiple of 128
    # to exercise the unpadded ragged-N path.
    B, n_vars, D, P = 2, 4, 32, 8           # nf = 256, M = 8
    target_window = 96

    x = jax.random.normal(k_x, (B, n_vars, D, P), dtype=jnp.float32)
    weight, bias = init_flatten_head_params(k_p, D * P, target_window)

    out = flatten_head_forward(x, weight, bias)
    out = jax.block_until_ready(out)

    ref = x.reshape(B, n_vars, D * P) @ weight + bias
    assert out.shape == (B, n_vars, target_window), out.shape
    assert jnp.allclose(out, ref, atol=1e-3, rtol=1e-3), float(
        jnp.max(jnp.abs(out - ref)))

    # Second small config exercising the N-tiled (128 | N, >=2 tiles) fused path.
    B2, n_vars2, D2, P2, N2 = 2, 8, 24, 16, 256   # nf = 384, M = 16
    x2 = jax.random.normal(k_x2, (B2, n_vars2, D2, P2), dtype=jnp.float32)
    w2, b2 = init_flatten_head_params(k_p2, D2 * P2, N2)
    out2 = jax.block_until_ready(flatten_head_forward(x2, w2, b2))
    ref2 = x2.reshape(B2, n_vars2, D2 * P2) @ w2 + b2
    assert jnp.allclose(out2, ref2, atol=1e-3, rtol=1e-3), float(
        jnp.max(jnp.abs(out2 - ref2)))

    print("KERNEL_OK")
</pallas_src>

<mosaic_0001>
module attributes {stable_mosaic.version = 11 : i64} {
  func.func @_linear_bias_kernel(%arg0: i32, %arg1: i32, %arg2: memref<8x256xf32, #tpu.memory_space<vmem>>, %arg3: memref<256x96xf32, #tpu.memory_space<vmem>>, %arg4: memref<1x96xf32, #tpu.memory_space<vmem>>, %arg5: memref<8x96xf32, #tpu.memory_space<vmem>>) attributes {dimension_semantics = [#tpu.dimension_semantics<parallel>, #tpu.dimension_semantics<parallel>], iteration_bounds = array<i64: 1, 1>, scalar_prefetch = 0 : i64, scratch_operands = 0 : i64, tpu.core_type = #tpu.core_type<tc>, window_params = [{transform_indices = @transform_0, window_bounds = array<i64: 8, 256>}, {transform_indices = @transform_1, window_bounds = array<i64: 256, 96>}, {transform_indices = @transform_2, window_bounds = array<i64: 1, 96>}, {transform_indices = @transform_3, window_bounds = array<i64: 8, 96>}]} {
    %c0 = arith.constant 0 : index
    %c0_0 = arith.constant 0 : index
    %0 = vector.load %arg2[%c0, %c0_0] : memref<8x256xf32, #tpu.memory_space<vmem>>, vector<8x256xf32>
    %c0_1 = arith.constant 0 : index
    %c0_2 = arith.constant 0 : index
    %1 = vector.load %arg3[%c0_1, %c0_2] : memref<256x96xf32, #tpu.memory_space<vmem>>, vector<256x96xf32>
    %cst = arith.constant dense<0.000000e+00> : vector<8x96xf32>
    %2 = tpu.matmul %0, %1, %cst {dimension_numbers = #tpu.dot_dimension_numbers<[1], [0], [0], [1], [0, 0, 1, 1], [], []>} : vector<8x256xf32>, vector<256x96xf32>, vector<8x96xf32> -> vector<8x96xf32>
    %c0_3 = arith.constant 0 : index
    %c0_4 = arith.constant 0 : index
    %3 = vector.load %arg4[%c0_3, %c0_4] : memref<1x96xf32, #tpu.memory_space<vmem>>, vector<1x96xf32>
    %4 = vector.broadcast %3 : vector<1x96xf32> to vector<8x96xf32>
    %5 = arith.addf %2, %4 : vector<8x96xf32>
    %c0_5 = arith.constant 0 : index
    %c0_6 = arith.constant 0 : index
    %6 = vector.load %arg5[%c0_5, %c0_6] : memref<8x96xf32, #tpu.memory_space<vmem>>, vector<8x96xf32>
    tpu.vector_store %arg5[%c0_5, %c0_6], %5 {strides = array<i32>} : memref<8x96xf32, #tpu.memory_space<vmem>>, vector<8x96xf32>,
    return
  }
  func.func @transform_0(%arg0: i32, %arg1: i32) -> (i32, i32) {
    %c0_i32 = arith.constant 0 : i32
    %c0_i32_0 = arith.constant 0 : i32
    return %arg1, %c0_i32 : i32, i32
  }
  func.func @transform_1(%arg0: i32, %arg1: i32) -> (i32, i32) {
    %c0_i32 = arith.constant 0 : i32
    %c0_i32_0 = arith.constant 0 : i32
    return %c0_i32, %arg0 : i32, i32
  }
  func.func @transform_2(%arg0: i32, %arg1: i32) -> (i32, i32) {
    %c0_i32 = arith.constant 0 : i32
    %c0_i32_0 = arith.constant 0 : i32
    return %c0_i32, %arg0 : i32, i32
  }
  func.func @transform_3(%arg0: i32, %arg1: i32) -> (i32, i32) {
    %c0_i32 = arith.constant 0 : i32
    return %arg1, %arg0 : i32, i32
  }
}

</mosaic_0001>

<bundles_post_ra>
// kernel: flatten_head_forward.1
= control target key start
LH: loop header
LB: loop body
LE: loop exit
PB: predicated region body
PF: predicated region fallthrough
CT: control target
= control target key end

     0   :  { %s268_s0 = inlined_call_operand.vmem [shape: f32[8,256], index: 0, kind: input, shape index: {}]   ;;  %s269_s1 = inlined_call_operand.vmem [shape: f32[256,96], index: 1, kind: input, shape index: {}]   ;;  %s270_s2 = inlined_call_operand.vmem [shape: f32[1,96], index: 2, kind: input, shape index: {}]   ;;  %s271_s3 = inlined_call_operand.hbm [shape: f32[8,96], index: 3, kind: output, shape index: {}]  }
   0x1   :  { %v32_v0 = vld [vmem:[%s269_s1 + $0x78] sm:$0xff]  ;;  %v31_v1 = vld [vmem:[%s269_s1 + $0x70] sm:$0xff]  ;;  %v30_v4 = vld [vmem:[%s269_s1 + $0x68] sm:$0xff] }
   0x2   :  { %v48_v2 = vld [vmem:[%s269_s1 + $0xf8] sm:$0xff]  ;;  %53 = vmatpush.msra.mxu0 %v32_v0  ;;  %v47_v3 = vld [vmem:[%s269_s1 + $0xf0] sm:$0xff]  ;;  %v46_v5 = vld [vmem:[%s269_s1 + $0xe8] sm:$0xff] }
   0x3   :  { %73 = vmatpush.msra.mxu1 %v48_v2  ;;  %v29_v6 = vld [vmem:[%s269_s1 + $0x60] sm:$0xff]  ;;  %v28_v8 = vld [vmem:[%s269_s1 + $0x58] sm:$0xff]  ;;  %v27_v10 = vld [vmem:[%s269_s1 + $0x50] sm:$0xff] }
   0x4   :  { %54 = vmatpush.msra.mxu0 %v31_v1  ;;  %v45_v7 = vld [vmem:[%s269_s1 + $0xe0] sm:$0xff]  ;;  %v44_v9 = vld [vmem:[%s269_s1 + $0xd8] sm:$0xff]  ;;  %v43_v11 = vld [vmem:[%s269_s1 + $0xd0] sm:$0xff] }
   0x5   :  { %74 = vmatpush.msra.mxu1 %v47_v3  ;;  %v26_v12 = vld [vmem:[%s269_s1 + $0x48] sm:$0xff]  ;;  %v25_v14 = vld [vmem:[%s269_s1 + $0x40] sm:$0xff] }
   0x6   :  { %55 = vmatpush.msra.mxu0 %v30_v4  ;;  %v42_v13 = vld [vmem:[%s269_s1 + $0xc8] sm:$0xff]  ;;  %v41_v15 = vld [vmem:[%s269_s1 + $0xc0] sm:$0xff] }
   0x7   :  { %75 = vmatpush.msra.mxu1 %v46_v5 }
   0x8   :  { %56 = vmatpush.msra.mxu0 %v29_v6 }
   0x9   :  { %76 = vmatpush.msra.mxu1 %v45_v7 }
   0xa   :  { %57 = vmatpush.msra.mxu0 %v28_v8 }
   0xb   :  { %77 = vmatpush.msra.mxu1 %v44_v9 }
   0xc   :  { %58 = vmatpush.msra.mxu0 %v27_v10 }
   0xd   :  { %78 = vmatpush.msra.mxu1 %v43_v11 }
   0xe   :  { %8 = vsyncpa [#allocation3], 0  ;;  %59 = vmatpush.msra.mxu0 %v26_v12  ;;  %v24_v16 = vld [vmem:[%s269_s1 + $0x38] sm:$0xff]  ;;  %v23_v18 = vld [vmem:[%s269_s1 + $0x30] sm:$0xff]  ;;  %s102_s4 = sshll.u32 %s271_s3, 4  ;;  %vm93_vm0 = vcmask 785408   ;;  %s103_s4 = int_to_ptr.hbm [resolvable:$true] %s102_s4 }
   0xf   :  { %79 = vmatpush.msra.mxu1 %v42_v13  ;;  %v40_v17 = vld [vmem:[%s269_s1 + $0xb8] sm:$0xff]  ;;  %v39_v19 = vld [vmem:[%s269_s1 + $0xb0] sm:$0xff]  ;;  %v22_v20 = vld [vmem:[%s269_s1 + $0x28] sm:$0xff] }
  0x10   :  { %60 = vmatpush.msra.mxu0 %v25_v14  ;;  %v38_v21 = vld [vmem:[%s269_s1 + $0xa8] sm:$0xff]  ;;  %v21_v22 = vld [vmem:[%s269_s1 + $0x20] sm:$0xff]  ;;  %v20_v24 = vld [vmem:[%s269_s1 + $0x18] sm:$0xff] }
  0x11   :  { %80 = vmatpush.msra.mxu1 %v41_v15  ;;  %v37_v23 = vld [vmem:[%s269_s1 + $0xa0] sm:$0xff]  ;;  %v36_v25 = vld [vmem:[%s269_s1 + $0x98] sm:$0xff]  ;;  %v19_v26 = vld [vmem:[%s269_s1 + $0x10] sm:$0xff] }
  0x12   :  { %61 = vmatpush.msra.mxu0 %v24_v16  ;;  %v35_v27 = vld [vmem:[%s269_s1 + $0x90] sm:$0xff]  ;;  %v18_v28 = vld [vmem:[%s269_s1 + $0x8] sm:$0xff]  ;;  %v17_v30 = vld [vmem:[%s269_s1] sm:$0xff] }
  0x13   :  { %81 = vmatpush.msra.mxu1 %v40_v17  ;;  %v34_v29 = vld [vmem:[%s269_s1 + $0x88] sm:$0xff]  ;;  %v33_v31 = vld [vmem:[%s269_s1 + $0x80] sm:$0xff]  ;;  %s139_s1 = smov [#allocation2]  }
  0x14   :  { %62 = vmatpush.msra.mxu0 %v23_v18  ;;  %v15_v32 = vld [vmem:[%s268_s0] sm:$0xff]  ;;  %v16_v33 = vld [vmem:[%s268_s0 + $0x8] sm:$0xff]  ;;  %s100_s28 = sshll.u32 %s139_s1, 4  ;;  %s101_s28 = int_to_ptr.vmem [resolvable:$true] %s100_s28 }
  0x15   :  { %82 = vmatpush.msra.mxu1 %v39_v19  ;;  %v112_v34 = vld [vmem:[%s270_s2] ss:$0 sm:$0xff] }
  0x16   :  { %63 = vmatpush.msra.mxu0 %v22_v20 }
  0x17   :  { %83 = vmatpush.msra.mxu1 %v38_v21 }
  0x18   :  { %64 = vmatpush.msra.mxu0 %v21_v22 }
  0x19   :  { %84 = vmatpush.msra.mxu1 %v37_v23 }
  0x1a   :  { %65 = vmatpush.msra.mxu0 %v20_v24 }
  0x1b   :  { %85 = vmatpush.msra.mxu1 %v36_v25 }
  0x1c   :  { %66 = vmatpush.msra.mxu0 %v19_v26 }
  0x1d   :  { %86 = vmatpush.msra.mxu1 %v35_v27 }
  0x1e   :  { %67 = vmatpush.msra.mxu0 %v18_v28 }
  0x1f   :  { %87 = vmatpush.msra.mxu1 %v34_v29 }
  0x20   :  { %68 = vmatpush.msra.mxu0 %v17_v30 }
  0x21   :  { %88 = vmatpush.msra.mxu1 %v33_v31  ;;  %69 = vmatmul.f32.vlgmr.msra.gmra.mxu0 %v15_v32 }
  0x22   :  { %89 = vmatmul.f32.vlgmr.msra.gmra.mxu1 %v16_v33 }
  0x9e   :  { %v70_v35 = vpop.f32.mrf.mxu0 }
  0x9f   :  { %v90_v36 = vpop.f32.mrf.mxu1  ;;  %v71_v37 = vadd.f32 %v112_v34, %v70_v35 }
  0xa1   :  { %v91_v38 = vadd.f32 %v90_v36, %v71_v37 }
  0xa3   :  { %94 = vst.msk [vmem:[#allocation2] sm:$0xff] %vm93_vm0, %v91_v38 }
  0xa4   :  { %105 = dma.vmem_to_hbm [thread:$0]  %s101_s28, 128, %s103_s4, [#allocation3]  }
  0xa5   :  { %137 = dma.done.wait [#allocation3], 128  }
  0xa6   :  { %138 = vsyncadd [#allocation3], 4294967168 }
  0xa7   :  { %110 = vsyncpa [#allocation3], 1 }

</bundles_post_ra>
